<compile_context>
chip_gen: v5e
topology: v5e:2x2
jax: 0.10.0
libtpu: 0.0.40
codegen_flags: <defaults>
</compile_context>

<pallas_src>
import jax
import jax.numpy as jnp
from jax.experimental import pallas as pl
from jax.experimental.pallas import tpu as pltpu


_LANE = 128                       # full vreg lane width -> unmasked vld/vst
_SMALL_INPUT_BYTES = 256 * 1024   # below this, XLA's fused elementwise already wins
_MiB = 1024 * 1024


def _round_up(a: int, b: int) -> int:
    return (a + b - 1) // b * b


def _vmem_capacity_bytes() -> int:
    """Physical VMEM per TensorCore; conservative (v7x = 64 MiB) if unknown."""
    try:
        info = pltpu.get_tpu_info()
        cap = getattr(info, "vmem_capacity_bytes", None)
        if cap:
            return int(cap)
    except Exception:
        pass
    return 64 * _MiB


def _tile_plan(rows: int, dtype) -> tuple[int, int]:
    """Pick (tile_rows, vmem_limit_bytes) for a (rows, 128) slab of `dtype`."""
    itemsize = jnp.dtype(dtype).itemsize
    # Sublane packing: 8 rows for 4-byte, 16 for 2-byte, 32 for 1-byte dtypes.
    pack = max(8, 32 // itemsize)

    if _vmem_capacity_bytes() <= 64 * _MiB:
        # v7x: 64 MiB physical VMEM -> 4 MiB tiles; 4 live buffers ~= 16 MiB.
        tile_bytes, vmem_limit = 4 * _MiB, 32 * _MiB
    else:
        # v5e/v6e: 128 MiB physical VMEM -> 8 MiB tiles; 4 live buffers ~= 32 MiB.
        tile_bytes, vmem_limit = 8 * _MiB, 64 * _MiB

    max_rows = max(pack, (tile_bytes // (_LANE * itemsize)) // pack * pack)
    # Guarantee >= 2 grid steps so the "parallel" axis can shard across the two
    # TensorCores on v7x even when the whole array would fit in a single tile.
    two_step_rows = max(pack, _round_up(pl.cdiv(rows, 2), pack))
    tile_r = min(max_rows, two_step_rows)
    return tile_r, vmem_limit


def _scale_kernel(scale_ref, x_ref, o_ref):
    # scale_ref: (1, 1) f32 in SMEM ; x_ref / o_ref: (tile_r, 128) tile in VMEM.
    # Multiply in f32 (the casts are no-ops for the common f32 FCOS path) and
    # write back in the input dtype.  VPU has huge slack here (mem-bound op).
    s = scale_ref[0, 0]
    o_ref[...] = (x_ref[...].astype(jnp.float32) * s).astype(o_ref.dtype)


def scale_forward(x: jax.Array, scale: jax.Array, *, donate_input: bool = False) -> jax.Array:
    """x: arbitrary-shaped array (e.g. NCHW); scale: 1-element learnable parameter."""
    orig_shape = x.shape
    orig_dtype = x.dtype
    total = int(x.size)
    itemsize = jnp.dtype(orig_dtype).itemsize

    # Learnable parameter stays in f32 (matches nn.Parameter(FloatTensor([v]))).
    scale_f32 = jnp.asarray(scale, dtype=jnp.float32).reshape(1, 1)

    # Plain-JAX fast paths (XLA's fused elementwise is already at HBM roofline):
    #   * empty / tiny inputs: kernel launch + reshape overhead dominates;
    #   * element counts not a multiple of 128: any pad/slice or prefix+concat
    #     repair costs extra full HBM passes (4-6N bytes vs 2N), so it would
    #     lose to plain JAX here.  The kernel only runs on copy-free-aligned sizes.
    if total == 0 or total % _LANE != 0 or total * itemsize < _SMALL_INPUT_BYTES:
        return (x.astype(jnp.float32) * scale_f32[0, 0]).astype(orig_dtype)

    # Copy-free, lane-dense view: row-major reshape to (rows, 128).
    rows = total // _LANE
    x2d = x.reshape(rows, _LANE)

    tile_r, vmem_limit = _tile_plan(rows, orig_dtype)
    grid = (pl.cdiv(rows, tile_r),)

    cost = pl.CostEstimate(
        flops=total,
        transcendentals=0,
        bytes_accessed=2 * total * itemsize,
    )

    out2d = pl.pallas_call(
        _scale_kernel,
        out_shape=jax.ShapeDtypeStruct((rows, _LANE), orig_dtype),
        grid_spec=pl.GridSpec(
            grid=grid,
            in_specs=[
                pl.BlockSpec(memory_space=pltpu.SMEM),             # scale (1,1) f32
                pl.BlockSpec((tile_r, _LANE), lambda i: (i, 0)),   # input tile
                # TODO(synk): if profiling on v7x shows exposed DMA at step
                # boundaries, add pipeline_mode=pl.Buffered(3) to the input spec.
            ],
            out_specs=pl.BlockSpec((tile_r, _LANE), lambda i: (i, 0)),
        ),
        compiler_params=pltpu.CompilerParams(
            dimension_semantics=("parallel",),   # no carry -> megacore-shardable
            vmem_limit_bytes=vmem_limit,
        ),
        cost_estimate=cost,
        # Opt-in in-place update: output reuses x's HBM buffer.  Off by default
        # because XLA inserts a full copy if the caller still needs x afterwards.
        input_output_aliases={1: 0} if donate_input else {},
    )(scale_f32, x2d)

    return out2d.reshape(orig_shape)


class ScalePallas:
    """JAX/Pallas equivalent of the PyTorch Scale module."""

    def __init__(self, init_value: float = 1.0):
        # Deterministic parameter init, same as nn.Parameter(FloatTensor([init_value])).
        self.scale = jnp.array([init_value], dtype=jnp.float32)

    def __call__(self, x: jax.Array) -> jax.Array:
        return scale_forward(x, self.scale)


if __name__ == "__main__":
    k1, k2 = jax.random.split(jax.random.PRNGKey(0))
    module = ScalePallas(init_value=1.5)

    # 1) Small FCOS-head-like feature map (takes the small-input fast path).
    x_small = jax.random.normal(k1, (2, 4, 16, 16), dtype=jnp.float32)
    out_small = jax.block_until_ready(module(x_small))
    ref_small = x_small * module.scale[0]
    assert out_small.shape == x_small.shape and out_small.dtype == x_small.dtype
    assert jnp.allclose(out_small, ref_small, atol=1e-6, rtol=1e-6)

    # 2) Larger 128-aligned feature map (exercises the Pallas kernel path:
    #    rows = 1024, split into 2 parallel tiles of 512 x 128).
    x_big = jax.random.normal(k2, (2, 4, 128, 128), dtype=jnp.float32)
    out_big = jax.block_until_ready(module(x_big))
    ref_big = x_big * module.scale[0]
    assert out_big.shape == x_big.shape and out_big.dtype == x_big.dtype
    assert jnp.allclose(out_big, ref_big, atol=1e-6, rtol=1e-6)

    print("KERNEL_OK")
</pallas_src>

<mosaic_0001>
module attributes {stable_mosaic.version = 11 : i64} {
  func.func @_scale_kernel(%arg0: i32, %arg1: memref<1x1xf32, #tpu.memory_space<smem>>, %arg2: memref<512x128xf32, #tpu.memory_space<vmem>>, %arg3: memref<512x128xf32, #tpu.memory_space<vmem>>) attributes {dimension_semantics = [#tpu.dimension_semantics<parallel>], iteration_bounds = array<i64: 2>, scalar_prefetch = 0 : i64, scratch_operands = 0 : i64, tpu.core_type = #tpu.core_type<tc>, window_params = [{transform_indices = @transform_0, window_bounds = array<i64: 1, 1>}, {transform_indices = @transform_1, window_bounds = array<i64: 512, 128>}, {transform_indices = @transform_2, window_bounds = array<i64: 512, 128>}]} {
    %c0 = arith.constant 0 : index
    %c0_0 = arith.constant 0 : index
    %0 = memref.load %arg1[%c0, %c0_0] : memref<1x1xf32, #tpu.memory_space<smem>>
    %c0_1 = arith.constant 0 : index
    %c0_2 = arith.constant 0 : index
    %1 = vector.load %arg2[%c0_1, %c0_2] : memref<512x128xf32, #tpu.memory_space<vmem>>, vector<512x128xf32>
    %2 = vector.broadcast %0 : f32 to vector<512x128xf32>
    %3 = arith.mulf %1, %2 : vector<512x128xf32>
    %c0_3 = arith.constant 0 : index
    %c0_4 = arith.constant 0 : index
    %4 = vector.load %arg3[%c0_3, %c0_4] : memref<512x128xf32, #tpu.memory_space<vmem>>, vector<512x128xf32>
    tpu.vector_store %arg3[%c0_3, %c0_4], %3 {strides = array<i32>} : memref<512x128xf32, #tpu.memory_space<vmem>>, vector<512x128xf32>,
    return
  }
  func.func @transform_0(%arg0: i32) -> (i32, i32) {
    %c0_i32 = arith.constant 0 : i32
    %c0_i32_0 = arith.constant 0 : i32
    %c0_i32_1 = arith.constant 0 : i32
    return %c0_i32, %c0_i32_0 : i32, i32
  }
  func.func @transform_1(%arg0: i32) -> (i32, i32) {
    %c0_i32 = arith.constant 0 : i32
    %c0_i32_0 = arith.constant 0 : i32
    return %arg0, %c0_i32 : i32, i32
  }
  func.func @transform_2(%arg0: i32) -> (i32, i32) {
    %c0_i32 = arith.constant 0 : i32
    %c0_i32_0 = arith.constant 0 : i32
    return %arg0, %c0_i32 : i32, i32
  }
}

</mosaic_0001>

<bundles_post_ra>
// kernel: tpu_custom_call.1
= control target key start
LH: loop header
LB: loop body
LE: loop exit
PB: predicated region body
PF: predicated region fallthrough
CT: control target
= control target key end

     0   :  { %s962_s0 = inlined_call_operand.<no memory space> [shape: f32[1,1], index: 0, kind: input, shape index: {}]   ;;  %s963_s1 = inlined_call_operand.hbm [shape: f32[1024,128], index: 1, kind: input, shape index: {}]   ;;  %s964_s2 = inlined_call_operand.hbm [shape: f32[1024,128], index: 2, kind: output, shape index: {}]  }
   0x1   :  { %7 = sst [smem:[#allocation2]] %s962_s0 }
   0x2   :  { %8 = vsyncpa [#allocation4], 0 }
   0x3   :  { %10 = vsyncpa [#allocation4 + $0x1], 0 }
   0x4   :  { %11 = vsyncpa [#allocation5], 0 }
   0x5   :  { %13 = vsyncpa [#allocation5 + $0x1], 0  ;;  %s636_s11 = smov 0   ;;  %s638_s12 = smov 0  }
   0x6   :  { %s640_s13 = smov 0   ;;  %s642_s14 = smov 0  }
   0x7 LB: > { %s657_s0 = sadd.s32 4294967295, %s612_s14   ;;  %s450_s15 = sadd.s32 4294967294, %s612_s14   ;;  %s612_s14 = sphi %s642_s14, %s974_s14   ;;  %s608_s13 = sphi %s640_s13, %s973_s13   ;;  %s604_s12 = sphi %s638_s12, %s972_s12   ;;  %s600_s11 = sphi %s636_s11, %s971_s11  }
   0x8   : > { %s661_s16 = sadd.s32 1, %s612_s14   ;;  %s47_s17 = sadd.s32 1, %s608_s13 }
   0x9   : > { %s44_s18 = ssub.s32 %s612_s14, %s661_s16  ;;  %p54_p0 = scmp.ne.s32.totalorder %s608_s13, %s604_s12 }
   0xa   : > { %p45_p1 = scmp.eq.s32.totalorder %s44_s18, 0  ;;  %p55_p2 = scmp.eq.s32.totalorder %s612_s14, 0 }
   0xb   : > { %p60_p3 = scmp.ne.s32.totalorder %s604_s12, %s600_s11  ;;  %p61_p4 = scmp.eq.s32.totalorder %s657_s0, 0 }
   0xc   : > { %s673_s19 = scalar_select %p45_p1, %s608_s13, %s47_s17  }
   0xd   : > { %p675_p5 = por %p55_p2, %p54_p0  ;;  %p679_p6 = por %p61_p4, %p60_p3 }
   0xe   : > { %p84_p7 = scmp.eq.s32.totalorder %s657_s0, 1  ;;  %p90_p8 = scmp.eq.s32.totalorder %s450_s15, 1 }
   0xf   : > { %p478_p10 = scmp.lt.s32.totalorder %s612_s14, 2  ;;  %s113_s24 = sand.u32 1, %s608_s13  }
  0x10   : > { %p686_p11 = por %p84_p7, %p54_p0  ;;  %p690_p12 = por %p90_p8, %p60_p3 }
  0x11   : > { %s464_s25 = sshll.u32 %s612_s14, 9  ;;  %s453_s26 = sshll.u32 %s113_s24, 9 }
  0x12   : > { %s122_s29 = scalar_lea.hbm %s963_s1, %s464_s25  ;;  %s117_s3 = scalar_lea.vmem [#allocation3], %s453_s26 }
  0x13   : > { %s123_s30 = sshll.u32 %s122_s29, 4  ;;  %s125_s4 = sshll.u32 %s117_s3, 4  ;;  %s124_s30 = int_to_ptr.hbm [resolvable:$true] %s123_s30  ;;  %s126_s4 = int_to_ptr.vmem [resolvable:$true] %s125_s4 }
  0x14   : > { %p701_p13 = pnand %p478_p10, %p675_p5  ;;  %p456_p0 = scmp.ge.s32.totalorder %s612_s14, 1 }
  0x15   : > { %p133_p1 = scmp.lt.s32.totalorder %s612_s14, 3  ;;  %s114_s6 = scalar_lea.sflag [#allocation4], %s113_s24 }
  0x16   : > { %s516_s7 = sshra.s32 %s124_s30, 4  ;;  %p520_p3 = pneg %p701_p13  ;;  %s517_s7 = int_to_ptr.hbm [resolvable:$true] %s516_s7 }
  0x17   : > { %s518_s8 = scalar_lea.hbm %s517_s7, 512  ;;  %s523_s15 = scalar_lea.hbm %s963_s1, 1024 }
  0x18   : > { %p519_p2 = scmp.ne.s32.totalorder %s517_s7, %s518_s8  ;;  %p524_p5 = scmp.lt.s32.totalorder %s517_s7, %s963_s1 }
  0x19   : > { %p525_p8 = scmp.lt.s32.totalorder %s523_s15, %s518_s8 }
  0x1a   : > { %p521_p4 = pnand %p520_p3, %p519_p2 }
  0x1b   : > { %p526_p10 = por %p525_p8, %p524_p5 }
  0x1c   : > { %p522_p7 = pneg %p521_p4 }
  0x1e   : > { %p527_p9 = pnand %p526_p10, %p522_p7 }
  0x20   : > { %530 = shalt.err (!%p527_p9)
}
  0x21   : > { %s614_s20 = smov 128   ;;  %s615_s24 = smov 8  }
  0x22   : > { %473 = dma.hbm_to_vmem [thread:$0]  (!%p701_p13), %s124_s30, 8192, %s126_s4, %s114_s6, %s614_s20, %s614_s20, %s615_s24  }
  0x23   : > { %p134_p2 = pnand %p456_p0, %p133_p1 }
  0x24   : > { %s722_s25 = sand.u32 (!%p134_p2), 1, %s604_s12  }
  0x25   : > { %137 = sbr.rel (%p134_p2) target bundleno = 119 (0x77), region = 28  ;;  %s457_s26 = sshll.u32 (!%p134_p2), %s722_s25, 9 }
  0x26   : > { %s140_s27 = scalar_lea.sflag (!%p134_p2), [#allocation4], %s722_s25  ;;  %s726_s28 = scalar_lea.vmem (!%p134_p2), [#allocation3], %s457_s26 }
  0x2a   : > { %591 = dma.done.wait (%p679_p6), %s140_s27, 8192  }
  0x2b   : > { %593 = vsyncadd (%p679_p6), %s140_s27, 4294959104  ;;  %s167_s29 = sld [smem:[#allocation2]]  ;;  %v168_v0 = vld [vmem:[%s726_s28] sm:$0xff]  ;;  %v169_v2 = vld [vmem:[%s726_s28 + $0x8] sm:$0xff]  ;;  %s745_s21 = scalar_lea.vmem [#allocation6], %s457_s26 }
  0x2c   : > { %v170_v3 = vld [vmem:[%s726_s28 + $0x10] sm:$0xff]  ;;  %v171_v7 = vld [vmem:[%s726_s28 + $0x18] sm:$0xff]  ;;  %v172_v8 = vld [vmem:[%s726_s28 + $0x20] sm:$0xff]  ;;  %s465_s30 = sshll.u32 %s657_s0, 9  ;;  %s374_s5 = sshll.u32 %s745_s21, 4  ;;  %s375_s5 = int_to_ptr.vmem [resolvable:$true] %s374_s5 }
  0x2d   : > { %v173_v9 = vld [vmem:[%s726_s28 + $0x28] sm:$0xff]  ;;  %v174_v11 = vld [vmem:[%s726_s28 + $0x30] sm:$0xff]  ;;  %v175_v13 = vld [vmem:[%s726_s28 + $0x38] sm:$0xff]  ;;  %s373_s0 = scalar_lea.hbm %s964_s2, %s465_s30  ;;  %s362_s7 = scalar_lea.sflag [#allocation5], %s722_s25 }
  0x2e   : > { %v176_v15 = vld [vmem:[%s726_s28 + $0x40] sm:$0xff]  ;;  %v177_v17 = vld [vmem:[%s726_s28 + $0x48] sm:$0xff]  ;;  %v178_v19 = vld [vmem:[%s726_s28 + $0x50] sm:$0xff]  ;;  %s376_s6 = sshll.u32 %s373_s0, 4  ;;  %s566_s17 = scalar_lea.hbm %s964_s2, 1024  ;;  %s377_s6 = int_to_ptr.hbm [resolvable:$true] %s376_s6 }
  0x2f   : > { %v179_v21 = vld [vmem:[%s726_s28 + $0x58] sm:$0xff]  ;;  %v180_v23 = vld [vmem:[%s726_s28 + $0x60] sm:$0xff]  ;;  %v181_v25 = vld [vmem:[%s726_s28 + $0x68] sm:$0xff]  ;;  %s560_s8 = sshra.s32 %s377_s6, 4  ;;  %s561_s8 = int_to_ptr.hbm [resolvable:$true] %s560_s8 }
  0x30   : > { %v182_v27 = vld [vmem:[%s726_s28 + $0x70] sm:$0xff]  ;;  %v183_v29 = vld [vmem:[%s726_s28 + $0x78] sm:$0xff]  ;;  %v184_v31 = vld [vmem:[%s726_s28 + $0x80] sm:$0xff]  ;;  %s562_s9 = scalar_lea.hbm %s561_s8, 512  ;;  %p567_p0 = scmp.lt.s32.totalorder %s561_s8, %s964_s2 }
  0x31   : > { %v733_v1 = vstv %s167_s29  ;;  %v185_v33 = vld [vmem:[%s726_s28 + $0x88] sm:$0xff]  ;;  %v186_v35 = vld [vmem:[%s726_s28 + $0x90] sm:$0xff]  ;;  %v187_v37 = vld [vmem:[%s726_s28 + $0x98] sm:$0xff]  ;;  %p563_p6 = scmp.ne.s32.totalorder %s561_s8, %s562_s9  ;;  %p568_p1 = scmp.lt.s32.totalorder %s566_s17, %s562_s9 }
  0x32   : > { %v233_v4 = vmul.f32 %v733_v1, %v168_v0  ;;  %v234_v5 = vmul.f32 %v733_v1, %v169_v2  ;;  %v235_v6 = vmul.f32 %v733_v1, %v170_v3  ;;  %v236_v10 = vmul.f32 %v733_v1, %v171_v7  ;;  %v188_v39 = vld [vmem:[%s726_s28 + $0xa0] sm:$0xff]  ;;  %v189_v41 = vld [vmem:[%s726_s28 + $0xa8] sm:$0xff]  ;;  %v190_v43 = vld [vmem:[%s726_s28 + $0xb0] sm:$0xff] }
  0x33   : > { %v237_v12 = vmul.f32 %v733_v1, %v172_v8  ;;  %v238_v14 = vmul.f32 %v733_v1, %v173_v9  ;;  %v239_v16 = vmul.f32 %v733_v1, %v174_v11  ;;  %v240_v18 = vmul.f32 %v733_v1, %v175_v13  ;;  %v191_v45 = vld [vmem:[%s726_s28 + $0xb8] sm:$0xff]  ;;  %v192_v47 = vld [vmem:[%s726_s28 + $0xc0] sm:$0xff]  ;;  %v193_v49 = vld [vmem:[%s726_s28 + $0xc8] sm:$0xff]  ;;  %p564_p9 = pnand %p563_p6, %p686_p11  ;;  %p569_p3 = por %p568_p1, %p567_p0 }
  0x34   : > { %297 = vst [vmem:[%s745_s21] sm:$0xff] %v233_v4  ;;  %v241_v20 = vmul.f32 %v733_v1, %v176_v15  ;;  %v242_v22 = vmul.f32 %v733_v1, %v177_v17  ;;  %v243_v24 = vmul.f32 %v733_v1, %v178_v19  ;;  %v244_v26 = vmul.f32 %v733_v1, %v179_v21  ;;  %v194_v51 = vld [vmem:[%s726_s28 + $0xd0] sm:$0xff]  ;;  %v195_v53 = vld [vmem:[%s726_s28 + $0xd8] sm:$0xff]  ;;  %v196_v55 = vld [vmem:[%s726_s28 + $0xe0] sm:$0xff] }
  0x35   : > { %298 = vst [vmem:[%s745_s21 + $0x8] sm:$0xff] %v234_v5  ;;  %v245_v28 = vmul.f32 %v733_v1, %v180_v23  ;;  %v246_v30 = vmul.f32 %v733_v1, %v181_v25  ;;  %v247_v32 = vmul.f32 %v733_v1, %v182_v27  ;;  %v248_v34 = vmul.f32 %v733_v1, %v183_v29  ;;  %v197_v57 = vld [vmem:[%s726_s28 + $0xe8] sm:$0xff]  ;;  %v198_v59 = vld [vmem:[%s726_s28 + $0xf0] sm:$0xff]  ;;  %v199_v61 = vld [vmem:[%s726_s28 + $0xf8] sm:$0xff]  ;;  %p565_p13 = pneg %p564_p9 }
  0x36   : > { %299 = vst [vmem:[%s745_s21 + $0x10] sm:$0xff] %v235_v6  ;;  %v249_v36 = vmul.f32 %v733_v1, %v184_v31  ;;  %v250_v38 = vmul.f32 %v733_v1, %v185_v33  ;;  %v251_v40 = vmul.f32 %v733_v1, %v186_v35  ;;  %v252_v42 = vmul.f32 %v733_v1, %v187_v37  ;;  %v200_v63 = vld [vmem:[%s726_s28 + $0x100] sm:$0xff]  ;;  %v201_v2 = vld [vmem:[%s726_s28 + $0x108] sm:$0xff]  ;;  %v202_v4 = vld [vmem:[%s726_s28 + $0x110] sm:$0xff] }
  0x37   : > { %300 = vst [vmem:[%s745_s21 + $0x18] sm:$0xff] %v236_v10  ;;  %v253_v44 = vmul.f32 %v733_v1, %v188_v39  ;;  %v254_v46 = vmul.f32 %v733_v1, %v189_v41  ;;  %v255_v48 = vmul.f32 %v733_v1, %v190_v43  ;;  %v256_v50 = vmul.f32 %v733_v1, %v191_v45  ;;  %v203_v6 = vld [vmem:[%s726_s28 + $0x118] sm:$0xff]  ;;  %v204_v8 = vld [vmem:[%s726_s28 + $0x120] sm:$0xff]  ;;  %v205_v10 = vld [vmem:[%s726_s28 + $0x128] sm:$0xff]  ;;  %p570_p4 = pnand %p569_p3, %p565_p13 }
  0x38   : > { %301 = vst [vmem:[%s745_s21 + $0x20] sm:$0xff] %v237_v12  ;;  %v257_v52 = vmul.f32 %v733_v1, %v192_v47  ;;  %v258_v54 = vmul.f32 %v733_v1, %v193_v49  ;;  %v259_v56 = vmul.f32 %v733_v1, %v194_v51  ;;  %v260_v58 = vmul.f32 %v733_v1, %v195_v53  ;;  %v206_v12 = vld [vmem:[%s726_s28 + $0x130] sm:$0xff] }
  0x39   : > { %302 = vst [vmem:[%s745_s21 + $0x28] sm:$0xff] %v238_v14  ;;  %v261_v60 = vmul.f32 %v733_v1, %v196_v55  ;;  %v262_v62 = vmul.f32 %v733_v1, %v197_v57  ;;  %v263_v0 = vmul.f32 %v733_v1, %v198_v59  ;;  %v264_v3 = vmul.f32 %v733_v1, %v199_v61  ;;  %v207_v14 = vld [vmem:[%s726_s28 + $0x138] sm:$0xff] }
  0x3a   : > { %303 = vst [vmem:[%s745_s21 + $0x30] sm:$0xff] %v239_v16  ;;  %v265_v5 = vmul.f32 %v733_v1, %v200_v63  ;;  %v266_v7 = vmul.f32 %v733_v1, %v201_v2  ;;  %v267_v9 = vmul.f32 %v733_v1, %v202_v4  ;;  %v268_v11 = vmul.f32 %v733_v1, %v203_v6  ;;  %v208_v16 = vld [vmem:[%s726_s28 + $0x140] sm:$0xff] }
  0x3b   : > { %304 = vst [vmem:[%s745_s21 + $0x38] sm:$0xff] %v240_v18  ;;  %v269_v13 = vmul.f32 %v733_v1, %v204_v8  ;;  %v270_v15 = vmul.f32 %v733_v1, %v205_v10  ;;  %v271_v17 = vmul.f32 %v733_v1, %v206_v12  ;;  %v209_v18 = vld [vmem:[%s726_s28 + $0x148] sm:$0xff]  ;;  %v272_v19 = vmul.f32 %v733_v1, %v207_v14 }
  0x3c   : > { %305 = vst [vmem:[%s745_s21 + $0x40] sm:$0xff] %v241_v20  ;;  %v210_v20 = vld [vmem:[%s726_s28 + $0x150] sm:$0xff]  ;;  %v273_v21 = vmul.f32 %v733_v1, %v208_v16  ;;  %v274_v23 = vmul.f32 %v733_v1, %v209_v18 }
  0x3d   : > { %306 = vst [vmem:[%s745_s21 + $0x48] sm:$0xff] %v242_v22  ;;  %v211_v22 = vld [vmem:[%s726_s28 + $0x158] sm:$0xff]  ;;  %v275_v25 = vmul.f32 %v733_v1, %v210_v20 }
  0x3e   : > { %307 = vst [vmem:[%s745_s21 + $0x50] sm:$0xff] %v243_v24  ;;  %v212_v24 = vld [vmem:[%s726_s28 + $0x160] sm:$0xff]  ;;  %v276_v27 = vmul.f32 %v733_v1, %v211_v22 }
  0x3f   : > { %308 = vst [vmem:[%s745_s21 + $0x58] sm:$0xff] %v244_v26  ;;  %v213_v26 = vld [vmem:[%s726_s28 + $0x168] sm:$0xff]  ;;  %v277_v29 = vmul.f32 %v733_v1, %v212_v24 }
  0x40   : > { %309 = vst [vmem:[%s745_s21 + $0x60] sm:$0xff] %v245_v28  ;;  %v214_v28 = vld [vmem:[%s726_s28 + $0x170] sm:$0xff]  ;;  %v278_v31 = vmul.f32 %v733_v1, %v213_v26 }
  0x41   : > { %310 = vst [vmem:[%s745_s21 + $0x68] sm:$0xff] %v246_v30  ;;  %v215_v30 = vld [vmem:[%s726_s28 + $0x178] sm:$0xff]  ;;  %v279_v33 = vmul.f32 %v733_v1, %v214_v28 }
  0x42   : > { %311 = vst [vmem:[%s745_s21 + $0x70] sm:$0xff] %v247_v32  ;;  %v216_v32 = vld [vmem:[%s726_s28 + $0x180] sm:$0xff]  ;;  %v280_v35 = vmul.f32 %v733_v1, %v215_v30 }
  0x43   : > { %312 = vst [vmem:[%s745_s21 + $0x78] sm:$0xff] %v248_v34  ;;  %v217_v34 = vld [vmem:[%s726_s28 + $0x188] sm:$0xff]  ;;  %v281_v37 = vmul.f32 %v733_v1, %v216_v32 }
  0x44   : > { %313 = vst [vmem:[%s745_s21 + $0x80] sm:$0xff] %v249_v36  ;;  %v218_v36 = vld [vmem:[%s726_s28 + $0x190] sm:$0xff]  ;;  %v282_v39 = vmul.f32 %v733_v1, %v217_v34 }
  0x45   : > { %314 = vst [vmem:[%s745_s21 + $0x88] sm:$0xff] %v250_v38  ;;  %v219_v38 = vld [vmem:[%s726_s28 + $0x198] sm:$0xff]  ;;  %v283_v41 = vmul.f32 %v733_v1, %v218_v36 }
  0x46   : > { %315 = vst [vmem:[%s745_s21 + $0x90] sm:$0xff] %v251_v40  ;;  %v220_v40 = vld [vmem:[%s726_s28 + $0x1a0] sm:$0xff]  ;;  %v284_v43 = vmul.f32 %v733_v1, %v219_v38 }
  0x47   : > { %316 = vst [vmem:[%s745_s21 + $0x98] sm:$0xff] %v252_v42  ;;  %v221_v42 = vld [vmem:[%s726_s28 + $0x1a8] sm:$0xff]  ;;  %v285_v45 = vmul.f32 %v733_v1, %v220_v40 }
  0x48   : > { %317 = vst [vmem:[%s745_s21 + $0xa0] sm:$0xff] %v253_v44  ;;  %v222_v44 = vld [vmem:[%s726_s28 + $0x1b0] sm:$0xff]  ;;  %v286_v47 = vmul.f32 %v733_v1, %v221_v42 }
  0x49   : > { %318 = vst [vmem:[%s745_s21 + $0xa8] sm:$0xff] %v254_v46  ;;  %v223_v46 = vld [vmem:[%s726_s28 + $0x1b8] sm:$0xff]  ;;  %v287_v49 = vmul.f32 %v733_v1, %v222_v44 }
  0x4a   : > { %319 = vst [vmem:[%s745_s21 + $0xb0] sm:$0xff] %v255_v48  ;;  %v224_v48 = vld [vmem:[%s726_s28 + $0x1c0] sm:$0xff]  ;;  %v288_v51 = vmul.f32 %v733_v1, %v223_v46 }
  0x4b   : > { %320 = vst [vmem:[%s745_s21 + $0xb8] sm:$0xff] %v256_v50  ;;  %v225_v50 = vld [vmem:[%s726_s28 + $0x1c8] sm:$0xff]  ;;  %v289_v53 = vmul.f32 %v733_v1, %v224_v48 }
  0x4c   : > { %321 = vst [vmem:[%s745_s21 + $0xc0] sm:$0xff] %v257_v52  ;;  %v226_v52 = vld [vmem:[%s726_s28 + $0x1d0] sm:$0xff]  ;;  %v290_v55 = vmul.f32 %v733_v1, %v225_v50 }
  0x4d   : > { %322 = vst [vmem:[%s745_s21 + $0xc8] sm:$0xff] %v258_v54  ;;  %v227_v54 = vld [vmem:[%s726_s28 + $0x1d8] sm:$0xff]  ;;  %v291_v57 = vmul.f32 %v733_v1, %v226_v52 }
  0x4e   : > { %323 = vst [vmem:[%s745_s21 + $0xd0] sm:$0xff] %v259_v56  ;;  %v228_v56 = vld [vmem:[%s726_s28 + $0x1e0] sm:$0xff]  ;;  %v292_v59 = vmul.f32 %v733_v1, %v227_v54 }
  0x4f   : > { %324 = vst [vmem:[%s745_s21 + $0xd8] sm:$0xff] %v260_v58  ;;  %v229_v58 = vld [vmem:[%s726_s28 + $0x1e8] sm:$0xff]  ;;  %v293_v61 = vmul.f32 %v733_v1, %v228_v56 }
  0x50   : > { %325 = vst [vmem:[%s745_s21 + $0xe0] sm:$0xff] %v261_v60  ;;  %v230_v60 = vld [vmem:[%s726_s28 + $0x1f0] sm:$0xff]  ;;  %v294_v63 = vmul.f32 %v733_v1, %v229_v58 }
  0x51   : > { %326 = vst [vmem:[%s745_s21 + $0xe8] sm:$0xff] %v262_v62  ;;  %v231_v62 = vld [vmem:[%s726_s28 + $0x1f8] sm:$0xff] }
  0x52   : > { %327 = vst [vmem:[%s745_s21 + $0xf0] sm:$0xff] %v263_v0  ;;  %v295_v0 = vmul.f32 %v733_v1, %v230_v60  ;;  %v296_v2 = vmul.f32 %v733_v1, %v231_v62 }
  0x53   : > { %328 = vst [vmem:[%s745_s21 + $0xf8] sm:$0xff] %v264_v3 }
  0x54   : > { %329 = vst [vmem:[%s745_s21 + $0x100] sm:$0xff] %v265_v5 }
  0x55   : > { %330 = vst [vmem:[%s745_s21 + $0x108] sm:$0xff] %v266_v7 }
  0x56   : > { %331 = vst [vmem:[%s745_s21 + $0x110] sm:$0xff] %v267_v9 }
  0x57   : > { %332 = vst [vmem:[%s745_s21 + $0x118] sm:$0xff] %v268_v11 }
  0x58   : > { %333 = vst [vmem:[%s745_s21 + $0x120] sm:$0xff] %v269_v13 }
  0x59   : > { %334 = vst [vmem:[%s745_s21 + $0x128] sm:$0xff] %v270_v15 }
  0x5a   : > { %335 = vst [vmem:[%s745_s21 + $0x130] sm:$0xff] %v271_v17 }
  0x5b   : > { %336 = vst [vmem:[%s745_s21 + $0x138] sm:$0xff] %v272_v19 }
  0x5c   : > { %337 = vst [vmem:[%s745_s21 + $0x140] sm:$0xff] %v273_v21 }
  0x5d   : > { %338 = vst [vmem:[%s745_s21 + $0x148] sm:$0xff] %v274_v23 }
  0x5e   : > { %339 = vst [vmem:[%s745_s21 + $0x150] sm:$0xff] %v275_v25 }
  0x5f   : > { %340 = vst [vmem:[%s745_s21 + $0x158] sm:$0xff] %v276_v27 }
  0x60   : > { %341 = vst [vmem:[%s745_s21 + $0x160] sm:$0xff] %v277_v29 }
  0x61   : > { %342 = vst [vmem:[%s745_s21 + $0x168] sm:$0xff] %v278_v31 }
  0x62   : > { %343 = vst [vmem:[%s745_s21 + $0x170] sm:$0xff] %v279_v33 }
  0x63   : > { %344 = vst [vmem:[%s745_s21 + $0x178] sm:$0xff] %v280_v35 }
  0x64   : > { %345 = vst [vmem:[%s745_s21 + $0x180] sm:$0xff] %v281_v37 }
  0x65   : > { %346 = vst [vmem:[%s745_s21 + $0x188] sm:$0xff] %v282_v39 }
  0x66   : > { %347 = vst [vmem:[%s745_s21 + $0x190] sm:$0xff] %v283_v41 }
  0x67   : > { %348 = vst [vmem:[%s745_s21 + $0x198] sm:$0xff] %v284_v43 }
  0x68   : > { %349 = vst [vmem:[%s745_s21 + $0x1a0] sm:$0xff] %v285_v45 }
  0x69   : > { %350 = vst [vmem:[%s745_s21 + $0x1a8] sm:$0xff] %v286_v47 }
  0x6a   : > { %351 = vst [vmem:[%s745_s21 + $0x1b0] sm:$0xff] %v287_v49 }
  0x6b   : > { %352 = vst [vmem:[%s745_s21 + $0x1b8] sm:$0xff] %v288_v51 }
  0x6c   : > { %353 = vst [vmem:[%s745_s21 + $0x1c0] sm:$0xff] %v289_v53 }
  0x6d   : > { %354 = vst [vmem:[%s745_s21 + $0x1c8] sm:$0xff] %v290_v55 }
  0x6e   : > { %355 = vst [vmem:[%s745_s21 + $0x1d0] sm:$0xff] %v291_v57 }
  0x6f   : > { %356 = vst [vmem:[%s745_s21 + $0x1d8] sm:$0xff] %v292_v59 }
  0x70   : > { %357 = vst [vmem:[%s745_s21 + $0x1e0] sm:$0xff] %v293_v61 }
  0x71   : > { %358 = vst [vmem:[%s745_s21 + $0x1e8] sm:$0xff] %v294_v63 }
  0x72   : > { %359 = vst [vmem:[%s745_s21 + $0x1f0] sm:$0xff] %v295_v0 }
  0x73   : > { %360 = vst [vmem:[%s745_s21 + $0x1f8] sm:$0xff] %v296_v2 }
  0x74   : > { %573 = shalt.err (!%p570_p4)
}
  0x75   : > { %s616_s24 = smov 128   ;;  %s617_s25 = smov 8  }
  0x76   : > { %468 = dma.vmem_to_hbm [thread:$0]  (%p686_p11), %s375_s5, 8192, %s377_s6, %s362_s7, %s616_s24, %s616_s24, %s617_s25  }
  0x77 PF: > { %s391_s26 = sand.u32 1, %s600_s11   ;;  %p970_p7 = scmp.ge.s32.totalorder %s612_s14, 2 }
  0x78   : > { %s392_s27 = scalar_lea.sflag [#allocation5], %s391_s26 }
  0x79   : > { %p475_p5 = pnand %p970_p7, %p690_p12 }
  0x7b   : > { %p476_p8 = pneg %p475_p5 }
  0x7d   : > { %595 = dma.done.wait (%p476_p8), %s392_s27, 8192  }
  0x7e   : > { %597 = vsyncadd (%p476_p8), %s392_s27, 4294959104  ;;  %p16_p10 = scmp.ge.s32.totalorder %s661_s16, 4   ;;  %s971_s11 = smov %s604_s12 }
  0x7f   : > { %s972_s12 = smov %s608_s13  ;;  %s973_s13 = smov %s673_s19 }
  0x80   : > { %s974_s14 = smov %s661_s16  ;;  %18 = sbr.rel (!%p16_p10) target bundleno = 7 (0x7), region = 73 }
  0x85   :  { %398 = vsyncpa [#allocation4], 1 }
  0x86   :  { %400 = vsyncpa [#allocation4 + $0x1], 1 }
  0x87   :  { %401 = vsyncpa [#allocation5], 1 }
  0x88   :  { %403 = vsyncpa [#allocation5 + $0x1], 1 }

</bundles_post_ra>
